<compile_context>
chip_gen: v7x
topology: tpu7x:2x2x1
jax: 0.10.0
libtpu: 0.0.40
codegen_flags: <defaults>
</compile_context>

<pallas_src>
import numpy as np
import jax
import jax.numpy as jnp
from jax.experimental import pallas as pl
from jax.experimental.pallas import tpu as pltpu


def _round_up(x, m):
    return ((x + m - 1) // m) * m


# ---------------------------------------------------------------------------
# Deterministic parameter construction (glue, plain numpy)
# ---------------------------------------------------------------------------
def hann_periodic(n_fft):
    n = np.arange(n_fft, dtype=np.float64)
    return 0.5 - 0.5 * np.cos(2.0 * np.pi * n / n_fft)


def fused_dft_basis(n_fft, f_pad):
    """Windowed real/imag DFT bases as used by torchlibrosa's conv-STFT,
    zero-padded to f_pad columns each and fused into one (n_fft, 2*f_pad)."""
    n_freq = n_fft // 2 + 1
    n = np.arange(n_fft, dtype=np.float64)
    k = np.arange(n_freq, dtype=np.float64)
    angle = 2.0 * np.pi * np.outer(n, k) / n_fft           # (n_fft, n_freq)
    win = hann_periodic(n_fft)[:, None]
    cos_b = np.zeros((n_fft, f_pad), dtype=np.float32)
    sin_b = np.zeros((n_fft, f_pad), dtype=np.float32)
    cos_b[:, :n_freq] = (np.cos(angle) * win).astype(np.float32)   # real part
    sin_b[:, :n_freq] = (-np.sin(angle) * win).astype(np.float32)  # imag (sign irrelevant for power)
    return np.concatenate([cos_b, sin_b], axis=1)          # (n_fft, 2*f_pad)


def mel_filterbank(sr, n_fft, n_mels, fmin, fmax):
    """librosa.filters.mel (htk=False, norm='slaney') re-implemented in numpy."""
    def hz_to_mel(f):
        f = np.asarray(f, dtype=np.float64)
        f_sp = 200.0 / 3.0
        mels = f / f_sp
        min_log_hz = 1000.0
        min_log_mel = min_log_hz / f_sp
        logstep = np.log(6.4) / 27.0
        return np.where(f >= min_log_hz,
                        min_log_mel + np.log(np.maximum(f, 1e-10) / min_log_hz) / logstep,
                        mels)

    def mel_to_hz(m):
        m = np.asarray(m, dtype=np.float64)
        f_sp = 200.0 / 3.0
        freqs = f_sp * m
        min_log_hz = 1000.0
        min_log_mel = min_log_hz / f_sp
        logstep = np.log(6.4) / 27.0
        return np.where(m >= min_log_mel,
                        min_log_hz * np.exp(logstep * (m - min_log_mel)),
                        freqs)

    n_freq = n_fft // 2 + 1
    fftfreqs = np.linspace(0.0, sr / 2.0, n_freq)
    mel_f = mel_to_hz(np.linspace(hz_to_mel(fmin), hz_to_mel(fmax), n_mels + 2))
    fdiff = np.diff(mel_f)
    ramps = mel_f[:, None] - fftfreqs[None, :]
    weights = np.zeros((n_mels, n_freq), dtype=np.float64)
    for i in range(n_mels):
        lower = -ramps[i] / fdiff[i]
        upper = ramps[i + 2] / fdiff[i + 1]
        weights[i] = np.maximum(0.0, np.minimum(lower, upper))
    enorm = 2.0 / (mel_f[2:n_mels + 2] - mel_f[:n_mels])
    weights *= enorm[:, None]
    return weights.T.astype(np.float32)   # (n_freq, n_mels)


# ---------------------------------------------------------------------------
# Pallas kernel: framed STFT (fused cos/sin matmul) -> power -> mel -> log10
# ---------------------------------------------------------------------------
def make_logmel_kernel(f_pad, amin, db_offset):
    def kernel(frames_ref, basis_ref, mel_ref, out_ref):
        frames = frames_ref[...]                                   # (TM, n_fft)
        spec = jnp.dot(frames, basis_ref[...],
                       preferred_element_type=jnp.float32)         # (TM, 2*f_pad)
        re = spec[:, :f_pad]                                       # 128-aligned split
        im = spec[:, f_pad:]
        power = re * re + im * im                                  # (TM, f_pad)
        mel = jnp.dot(power, mel_ref[...],
                      preferred_element_type=jnp.float32)          # (TM, mel_pad=128k)
        out_ref[...] = 10.0 * jnp.log10(jnp.maximum(mel, amin)) - db_offset
    return kernel


def extract_feature(inputs, *, sample_rate, num_mel=40, n_fft=1024,
                    hop_length=128, fmin=0, ref=1.0, amin=1e-6, tm=256):
    """JAX/Pallas equivalent of ExtractFeature.forward.

    inputs: (B, L) float32 waveform.
    returns: (B, 1, T, num_mel) float32 log-mel spectrogram.
    """
    B, L = inputs.shape
    fmax = sample_rate // 2
    n_freq = n_fft // 2 + 1
    f_pad = _round_up(n_freq, 128)        # lane-padded frequency width
    mel_pad = _round_up(num_mel, 128)     # lane-dense output width
    pad = n_fft // 2

    # ---- glue: reflect pad (center=True, pad_mode='reflect') and framing ----
    x_pad = jnp.pad(inputs, ((0, 0), (pad, pad)), mode="reflect")
    T = (L + 2 * pad - n_fft) // hop_length + 1
    frame_idx = (np.arange(T)[:, None] * hop_length
                 + np.arange(n_fft)[None, :])                      # (T, n_fft)
    frames = x_pad[:, frame_idx].reshape(B * T, n_fft)             # (B*T, n_fft)
    # TODO(synk): framing could be moved in-kernel (manual DMA of a
    # ((tm-1)*hop + n_fft)-sample window per tile) to cut HBM reads ~n_fft/hop x;
    # kernel is MXU-bound so the XLA gather is kept in glue here.

    # pad rows to a multiple of the row tile (clamp tile for tiny inputs)
    N = B * T
    tm = min(tm, _round_up(N, 128))
    Np = _round_up(N, tm)
    frames = jnp.pad(frames, ((0, Np - N), (0, 0)))

    # ---- deterministic "weights" (zero-padded to lane-aligned shapes) ----
    basis = jnp.asarray(fused_dft_basis(n_fft, f_pad))             # (n_fft, 2*f_pad)
    melW = mel_filterbank(sample_rate, n_fft, num_mel, fmin, fmax) # (n_freq, num_mel)
    melW_p = np.zeros((f_pad, mel_pad), dtype=np.float32)
    melW_p[:n_freq, :num_mel] = melW
    melW_p = jnp.asarray(melW_p)

    db_offset = float(10.0 * np.log10(np.maximum(amin, ref)))      # = 0 for ref=1.0
    kernel = make_logmel_kernel(f_pad, float(amin), db_offset)

    cost = pl.CostEstimate(
        flops=int(2 * Np * n_fft * (2 * f_pad) + 2 * Np * f_pad * mel_pad),
        transcendentals=int(Np * mel_pad),
        bytes_accessed=int(4 * (Np * n_fft + n_fft * 2 * f_pad
                                + f_pad * mel_pad + Np * mel_pad)),
    )

    out = pl.pallas_call(
        kernel,
        out_shape=jax.ShapeDtypeStruct((Np, mel_pad), jnp.float32),
        grid=(pl.cdiv(Np, tm),),
        in_specs=[
            pl.BlockSpec((tm, n_fft), lambda i: (i, 0)),            # frames tile
            pl.BlockSpec((n_fft, 2 * f_pad), lambda i: (0, 0)),     # fused cos|sin basis
            pl.BlockSpec((f_pad, mel_pad), lambda i: (0, 0)),       # mel filterbank
        ],
        out_specs=pl.BlockSpec((tm, mel_pad), lambda i: (i, 0)),    # lane-dense output
        compiler_params=pltpu.CompilerParams(
            dimension_semantics=("parallel",),
            vmem_limit_bytes=48 * 1024 * 1024),
        cost_estimate=cost,
    )(frames, basis, melW_p)

    logmel = out[:N, :num_mel].reshape(B, T, num_mel)
    return logmel[:, None, :, :]                                   # (B, 1, T, n_mels)


if __name__ == "__main__":
    # Small shapes consistent with the module (smaller n_fft for a compact test).
    SAMPLE_RATE = 8000
    N_FFT = 256
    HOP = 64
    NUM_MEL = 40
    B, L = 2, 1024

    key = jax.random.PRNGKey(0)
    wav = jax.random.normal(key, (B, L), dtype=jnp.float32)

    fn = jax.jit(lambda w: extract_feature(
        w, sample_rate=SAMPLE_RATE, num_mel=NUM_MEL,
        n_fft=N_FFT, hop_length=HOP, fmin=0, ref=1.0, amin=1e-6))

    logmel = fn(wav)
    jax.block_until_ready(logmel)

    assert logmel.shape == (B, 1, L // HOP + 1, NUM_MEL), logmel.shape
    assert logmel.dtype == jnp.float32
    assert bool(jnp.all(jnp.isfinite(logmel)))
    print("KERNEL_OK")
</pallas_src>

<mosaic_0001>
module attributes {stable_mosaic.version = 11 : i64} {
  func.func @kernel(%arg0: i32, %arg1: memref<128x256xf32, #tpu.memory_space<vmem>>, %arg2: memref<256x512xf32, #tpu.memory_space<vmem>>, %arg3: memref<256x128xf32, #tpu.memory_space<vmem>>, %arg4: memref<128x128xf32, #tpu.memory_space<vmem>>) attributes {dimension_semantics = [#tpu.dimension_semantics<parallel>], iteration_bounds = array<i64: 1>, scalar_prefetch = 0 : i64, scratch_operands = 0 : i64, tpu.core_type = #tpu.core_type<tc>, window_params = [{transform_indices = @transform_0, window_bounds = array<i64: 128, 256>}, {pipeline_mode = #tpu.pipeline_mode<synchronous>, transform_indices = @transform_1, window_bounds = array<i64: 256, 512>}, {pipeline_mode = #tpu.pipeline_mode<synchronous>, transform_indices = @transform_2, window_bounds = array<i64: 256, 128>}, {transform_indices = @transform_3, window_bounds = array<i64: 128, 128>}]} {
    %c0 = arith.constant 0 : index
    %c0_0 = arith.constant 0 : index
    %0 = vector.load %arg1[%c0, %c0_0] : memref<128x256xf32, #tpu.memory_space<vmem>>, vector<128x256xf32>
    %c0_1 = arith.constant 0 : index
    %c0_2 = arith.constant 0 : index
    %1 = vector.load %arg2[%c0_1, %c0_2] : memref<256x512xf32, #tpu.memory_space<vmem>>, vector<256x512xf32>
    %cst = arith.constant dense<0.000000e+00> : vector<128x512xf32>
    %2 = tpu.matmul %0, %1, %cst {dimension_numbers = #tpu.dot_dimension_numbers<[1], [0], [0], [1], [0, 0, 1, 1], [], []>} : vector<128x256xf32>, vector<256x512xf32>, vector<128x512xf32> -> vector<128x512xf32>
    %3 = vector.extract_strided_slice %2 {offsets = [0, 0], sizes = [128, 256], strides = [1, 1]} : vector<128x512xf32> to vector<128x256xf32>
    %4 = vector.extract_strided_slice %2 {offsets = [0, 256], sizes = [128, 256], strides = [1, 1]} : vector<128x512xf32> to vector<128x256xf32>
    %5 = arith.mulf %3, %3 : vector<128x256xf32>
    %6 = arith.mulf %4, %4 : vector<128x256xf32>
    %7 = arith.addf %5, %6 : vector<128x256xf32>
    %c0_3 = arith.constant 0 : index
    %c0_4 = arith.constant 0 : index
    %8 = vector.load %arg3[%c0_3, %c0_4] : memref<256x128xf32, #tpu.memory_space<vmem>>, vector<256x128xf32>
    %cst_5 = arith.constant dense<0.000000e+00> : vector<128x128xf32>
    %9 = tpu.matmul %7, %8, %cst_5 {dimension_numbers = #tpu.dot_dimension_numbers<[1], [0], [0], [1], [0, 0, 1, 1], [], []>} : vector<128x256xf32>, vector<256x128xf32>, vector<128x128xf32> -> vector<128x128xf32>
    %cst_6 = arith.constant 9.99999997E-7 : f32
    %10 = vector.broadcast %cst_6 : f32 to vector<128x128xf32>
    %11 = arith.maximumf %9, %10 : vector<128x128xf32>
    %12 = math.log %11 : vector<128x128xf32>
    %cst_7 = arith.constant 0.434294492 : f32
    %13 = vector.broadcast %cst_7 : f32 to vector<128x128xf32>
    %14 = arith.mulf %12, %13 : vector<128x128xf32>
    %cst_8 = arith.constant 1.000000e+01 : f32
    %15 = vector.broadcast %cst_8 : f32 to vector<128x128xf32>
    %16 = arith.mulf %15, %14 : vector<128x128xf32>
    %cst_9 = arith.constant 0.000000e+00 : f32
    %17 = vector.broadcast %cst_9 : f32 to vector<128x128xf32>
    %18 = arith.subf %16, %17 : vector<128x128xf32>
    %c0_10 = arith.constant 0 : index
    %c0_11 = arith.constant 0 : index
    %19 = vector.load %arg4[%c0_10, %c0_11] : memref<128x128xf32, #tpu.memory_space<vmem>>, vector<128x128xf32>
    tpu.vector_store %arg4[%c0_10, %c0_11], %18 {strides = array<i32>} : memref<128x128xf32, #tpu.memory_space<vmem>>, vector<128x128xf32>,
    return
  }
  func.func @transform_0(%arg0: i32) -> (i32, i32) {
    %c0_i32 = arith.constant 0 : i32
    %c0_i32_0 = arith.constant 0 : i32
    return %arg0, %c0_i32 : i32, i32
  }
  func.func @transform_1(%arg0: i32) -> (i32, i32) {
    %c0_i32 = arith.constant 0 : i32
    %c0_i32_0 = arith.constant 0 : i32
    %c0_i32_1 = arith.constant 0 : i32
    return %c0_i32, %c0_i32_0 : i32, i32
  }
  func.func @transform_2(%arg0: i32) -> (i32, i32) {
    %c0_i32 = arith.constant 0 : i32
    %c0_i32_0 = arith.constant 0 : i32
    %c0_i32_1 = arith.constant 0 : i32
    return %c0_i32, %c0_i32_0 : i32, i32
  }
  func.func @transform_3(%arg0: i32) -> (i32, i32) {
    %c0_i32 = arith.constant 0 : i32
    %c0_i32_0 = arith.constant 0 : i32
    return %arg0, %c0_i32 : i32, i32
  }
}

</mosaic_0001>

<bundles_post_ra>
// kernel: _lambda_.1
= control target key start
LH: loop header
LB: loop body
LE: loop exit
PB: predicated region body
PF: predicated region fallthrough
CT: control target
= control target key end

     0   :  { %s1801_s1 = inlined_call_operand.vmem [shape: f32[256,512], index: 1, kind: input, shape index: {}]   ;;  %s1802_s0 = inlined_call_operand.vmem [shape: f32[128,256], index: 0, kind: input, shape index: {}]   ;;  %s1803_s2 = inlined_call_operand.vmem [shape: f32[256,128], index: 2, kind: input, shape index: {}]   ;;  %s1804_s3 = inlined_call_operand.vmem [shape: f32[128,128], index: 3, kind: output, shape index: {}]  }
   0x1   :  { %v47_v0 = vld [vmem:[%s1801_s1 + $0x8] sm:$0xff]  ;;  %v49_v2 = vld [vmem:[%s1801_s1 + $0x18] sm:$0xff]  ;;  %v46_v5 = vld [vmem:[%s1801_s1] sm:$0xff] }
   0x2   :  { %v51_v1 = vld [vmem:[%s1801_s1 + $0x28] sm:$0xff]  ;;  %v53_v4 = vld [vmem:[%s1801_s1 + $0x38] sm:$0xff]  ;;  %v50_v6 = vld [vmem:[%s1801_s1 + $0x20] sm:$0xff] }
   0x3   :  { %v949_v3 = vpack.c.bf16 %v51_v1, %v47_v0  ;;  %v1013_v7 = vpack.c.bf16 %v53_v4, %v49_v2  ;;  %v951_v8 = vpack.c.bf16 %v50_v6, %v46_v5  ;;  %v48_v9 = vld [vmem:[%s1801_s1 + $0x10] sm:$0xff]  ;;  %v55_v11 = vld [vmem:[%s1801_s1 + $0x48] sm:$0xff]  ;;  %v57_v14 = vld [vmem:[%s1801_s1 + $0x58] sm:$0xff] }
   0x4   :  { %v52_v10 = vld [vmem:[%s1801_s1 + $0x30] sm:$0xff]  ;;  %v59_v13 = vld [vmem:[%s1801_s1 + $0x68] sm:$0xff]  ;;  %v61_v15 = vld [vmem:[%s1801_s1 + $0x78] sm:$0xff] }
   0x5   :  { %950 = vmatprep.subr.bf16.mxu0 %v949_v3  ;;  %v1015_v12 = vpack.c.bf16 %v52_v10, %v48_v9  ;;  %1014 = vmatprep.subr.bf16.mxu1 %v1013_v7  ;;  %v953_v16 = vpack.c.bf16 %v59_v13, %v55_v11  ;;  %v1017_v17 = vpack.c.bf16 %v61_v15, %v57_v14  ;;  %v54_v18 = vld [vmem:[%s1801_s1 + $0x40] sm:$0xff]  ;;  %v56_v20 = vld [vmem:[%s1801_s1 + $0x50] sm:$0xff]  ;;  %v63_v23 = vld [vmem:[%s1801_s1 + $0x88] sm:$0xff] }
   0x6   :  { %952 = vmatpush1.bf16.msra.mxu0 %v951_v8  ;;  %v58_v19 = vld [vmem:[%s1801_s1 + $0x60] sm:$0xff]  ;;  %v60_v22 = vld [vmem:[%s1801_s1 + $0x70] sm:$0xff]  ;;  %v67_v24 = vld [vmem:[%s1801_s1 + $0xa8] sm:$0xff] }
   0x7   :  { %1016 = vmatpush1.bf16.msra.mxu1 %v1015_v12  ;;  %v955_v21 = vpack.c.bf16 %v58_v19, %v54_v18  ;;  %954 = vmatprep.subr.bf16.mxu0 %v953_v16  ;;  %v1019_v25 = vpack.c.bf16 %v60_v22, %v56_v20  ;;  %v957_v26 = vpack.c.bf16 %v67_v24, %v63_v23  ;;  %v65_v27 = vld [vmem:[%s1801_s1 + $0x98] sm:$0xff]  ;;  %v62_v29 = vld [vmem:[%s1801_s1 + $0x80] sm:$0xff]  ;;  %v64_v32 = vld [vmem:[%s1801_s1 + $0x90] sm:$0xff] }
   0x8   :  { %1018 = vmatprep.subr.bf16.mxu1 %v1017_v17  ;;  %v69_v28 = vld [vmem:[%s1801_s1 + $0xb8] sm:$0xff]  ;;  %v66_v31 = vld [vmem:[%s1801_s1 + $0xa0] sm:$0xff]  ;;  %v68_v33 = vld [vmem:[%s1801_s1 + $0xb0] sm:$0xff] }
   0x9   :  { %v1021_v30 = vpack.c.bf16 %v69_v28, %v65_v27  ;;  %v959_v34 = vpack.c.bf16 %v66_v31, %v62_v29  ;;  %v71_v35 = vld [vmem:[%s1801_s1 + $0xc8] sm:$0xff]  ;;  %v73_v37 = vld [vmem:[%s1801_s1 + $0xd8] sm:$0xff]  ;;  %v1023_v38 = vpack.c.bf16 %v68_v33, %v64_v32  ;;  %v70_v41 = vld [vmem:[%s1801_s1 + $0xc0] sm:$0xff] }
   0xa   :  { %956 = vmatpush1.bf16.msra.mxu0 %v955_v21  ;;  %v75_v36 = vld [vmem:[%s1801_s1 + $0xe8] sm:$0xff]  ;;  %v77_v40 = vld [vmem:[%s1801_s1 + $0xf8] sm:$0xff]  ;;  %v74_v42 = vld [vmem:[%s1801_s1 + $0xe0] sm:$0xff] }
   0xb   :  { %1020 = vmatpush1.bf16.msra.mxu1 %v1019_v25  ;;  %958 = vmatprep.subr.bf16.mxu0 %v957_v26  ;;  %v961_v39 = vpack.c.bf16 %v75_v36, %v71_v35  ;;  %v1025_v43 = vpack.c.bf16 %v77_v40, %v73_v37  ;;  %v72_v44 = vld [vmem:[%s1801_s1 + $0xd0] sm:$0xff]  ;;  %v79_v46 = vld [vmem:[%s1801_s1 + $0x108] sm:$0xff]  ;;  %v81_v48 = vld [vmem:[%s1801_s1 + $0x118] sm:$0xff]  ;;  %v963_v50 = vpack.c.bf16 %v74_v42, %v70_v41 }
   0xc   :  { %1022 = vmatprep.subr.bf16.mxu1 %v1021_v30  ;;  %v76_v45 = vld [vmem:[%s1801_s1 + $0xf0] sm:$0xff]  ;;  %v83_v47 = vld [vmem:[%s1801_s1 + $0x128] sm:$0xff]  ;;  %v85_v49 = vld [vmem:[%s1801_s1 + $0x138] sm:$0xff] }
   0xd   :  { %v1027_v51 = vpack.c.bf16 %v76_v45, %v72_v44  ;;  %v965_v52 = vpack.c.bf16 %v83_v47, %v79_v46  ;;  %v78_v53 = vld [vmem:[%s1801_s1 + $0x100] sm:$0xff]  ;;  %v80_v55 = vld [vmem:[%s1801_s1 + $0x110] sm:$0xff]  ;;  %v1029_v56 = vpack.c.bf16 %v85_v49, %v81_v48  ;;  %v87_v58 = vld [vmem:[%s1801_s1 + $0x148] sm:$0xff] }
   0xe   :  { %960 = vmatpush1.bf16.msra.mxu0 %v959_v34  ;;  %v82_v54 = vld [vmem:[%s1801_s1 + $0x120] sm:$0xff]  ;;  %v84_v57 = vld [vmem:[%s1801_s1 + $0x130] sm:$0xff]  ;;  %v91_v59 = vld [vmem:[%s1801_s1 + $0x168] sm:$0xff] }
   0xf   :  { %1024 = vmatpush1.bf16.msra.mxu1 %v1023_v38  ;;  %962 = vmatprep.subr.bf16.mxu0 %v961_v39  ;;  %v89_v60 = vld [vmem:[%s1801_s1 + $0x158] sm:$0xff]  ;;  %v967_v62 = vpack.c.bf16 %v82_v54, %v78_v53  ;;  %v1031_v63 = vpack.c.bf16 %v84_v57, %v80_v55  ;;  %v969_v0 = vpack.c.bf16 %v91_v59, %v87_v58  ;;  %v86_v1 = vld [vmem:[%s1801_s1 + $0x140] sm:$0xff]  ;;  %v88_v3 = vld [vmem:[%s1801_s1 + $0x150] sm:$0xff] }
  0x10   :  { %1026 = vmatprep.subr.bf16.mxu1 %v1025_v43  ;;  %v93_v61 = vld [vmem:[%s1801_s1 + $0x178] sm:$0xff]  ;;  %v90_v2 = vld [vmem:[%s1801_s1 + $0x160] sm:$0xff]  ;;  %v92_v5 = vld [vmem:[%s1801_s1 + $0x170] sm:$0xff] }
  0x11   :  { %v1033_v4 = vpack.c.bf16 %v93_v61, %v89_v60  ;;  %v95_v6 = vld [vmem:[%s1801_s1 + $0x188] sm:$0xff]  ;;  %v97_v8 = vld [vmem:[%s1801_s1 + $0x198] sm:$0xff]  ;;  %v971_v10 = vpack.c.bf16 %v90_v2, %v86_v1  ;;  %v1035_v11 = vpack.c.bf16 %v92_v5, %v88_v3  ;;  %v94_v13 = vld [vmem:[%s1801_s1 + $0x180] sm:$0xff] }
  0x12   :  { %964 = vmatpush1.bf16.msra.mxu0 %v963_v50  ;;  %v99_v7 = vld [vmem:[%s1801_s1 + $0x1a8] sm:$0xff]  ;;  %v101_v9 = vld [vmem:[%s1801_s1 + $0x1b8] sm:$0xff]  ;;  %v98_v14 = vld [vmem:[%s1801_s1 + $0x1a0] sm:$0xff] }
  0x13   :  { %1028 = vmatpush1.bf16.msra.mxu1 %v1027_v51  ;;  %966 = vmatprep.subr.bf16.mxu0 %v965_v52  ;;  %v973_v12 = vpack.c.bf16 %v99_v7, %v95_v6  ;;  %v96_v15 = vld [vmem:[%s1801_s1 + $0x190] sm:$0xff]  ;;  %v1037_v16 = vpack.c.bf16 %v101_v9, %v97_v8  ;;  %v103_v18 = vld [vmem:[%s1801_s1 + $0x1c8] sm:$0xff]  ;;  %v105_v20 = vld [vmem:[%s1801_s1 + $0x1d8] sm:$0xff]  ;;  %v975_v22 = vpack.c.bf16 %v98_v14, %v94_v13 }
  0x14   :  { %1030 = vmatprep.subr.bf16.mxu1 %v1029_v56  ;;  %v100_v17 = vld [vmem:[%s1801_s1 + $0x1b0] sm:$0xff]  ;;  %v107_v19 = vld [vmem:[%s1801_s1 + $0x1e8] sm:$0xff]  ;;  %v109_v21 = vld [vmem:[%s1801_s1 + $0x1f8] sm:$0xff] }
  0x15   :  { %v1039_v23 = vpack.c.bf16 %v100_v17, %v96_v15  ;;  %v977_v24 = vpack.c.bf16 %v107_v19, %v103_v18  ;;  %v102_v25 = vld [vmem:[%s1801_s1 + $0x1c0] sm:$0xff]  ;;  %v104_v27 = vld [vmem:[%s1801_s1 + $0x1d0] sm:$0xff]  ;;  %v1041_v28 = vpack.c.bf16 %v109_v21, %v105_v20  ;;  %v111_v30 = vld [vmem:[%s1801_s1 + $0x208] sm:$0xff] }
  0x16   :  { %968 = vmatpush1.bf16.msra.mxu0 %v967_v62  ;;  %v106_v26 = vld [vmem:[%s1801_s1 + $0x1e0] sm:$0xff]  ;;  %v108_v29 = vld [vmem:[%s1801_s1 + $0x1f0] sm:$0xff]  ;;  %v115_v31 = vld [vmem:[%s1801_s1 + $0x228] sm:$0xff] }
  0x17   :  { %1032 = vmatpush1.bf16.msra.mxu1 %v1031_v63  ;;  %970 = vmatprep.subr.bf16.mxu0 %v969_v0  ;;  %v113_v32 = vld [vmem:[%s1801_s1 + $0x218] sm:$0xff]  ;;  %v979_v34 = vpack.c.bf16 %v106_v26, %v102_v25  ;;  %v1043_v35 = vpack.c.bf16 %v108_v29, %v104_v27  ;;  %v981_v36 = vpack.c.bf16 %v115_v31, %v111_v30  ;;  %v110_v37 = vld [vmem:[%s1801_s1 + $0x200] sm:$0xff]  ;;  %v112_v39 = vld [vmem:[%s1801_s1 + $0x210] sm:$0xff] }
  0x18   :  { %1034 = vmatprep.subr.bf16.mxu1 %v1033_v4  ;;  %v117_v33 = vld [vmem:[%s1801_s1 + $0x238] sm:$0xff]  ;;  %v114_v38 = vld [vmem:[%s1801_s1 + $0x220] sm:$0xff]  ;;  %v116_v41 = vld [vmem:[%s1801_s1 + $0x230] sm:$0xff] }
  0x19   :  { %v1045_v40 = vpack.c.bf16 %v117_v33, %v113_v32  ;;  %v119_v42 = vld [vmem:[%s1801_s1 + $0x248] sm:$0xff]  ;;  %v121_v44 = vld [vmem:[%s1801_s1 + $0x258] sm:$0xff]  ;;  %v983_v46 = vpack.c.bf16 %v114_v38, %v110_v37  ;;  %v1047_v47 = vpack.c.bf16 %v116_v41, %v112_v39  ;;  %v118_v49 = vld [vmem:[%s1801_s1 + $0x240] sm:$0xff] }
  0x1a   :  { %972 = vmatpush1.bf16.msra.mxu0 %v971_v10  ;;  %v123_v43 = vld [vmem:[%s1801_s1 + $0x268] sm:$0xff]  ;;  %v125_v45 = vld [vmem:[%s1801_s1 + $0x278] sm:$0xff]  ;;  %v122_v50 = vld [vmem:[%s1801_s1 + $0x260] sm:$0xff] }
  0x1b   :  { %1036 = vmatpush1.bf16.msra.mxu1 %v1035_v11  ;;  %974 = vmatprep.subr.bf16.mxu0 %v973_v12  ;;  %v985_v48 = vpack.c.bf16 %v123_v43, %v119_v42  ;;  %v120_v51 = vld [vmem:[%s1801_s1 + $0x250] sm:$0xff]  ;;  %v1049_v52 = vpack.c.bf16 %v125_v45, %v121_v44  ;;  %v127_v54 = vld [vmem:[%s1801_s1 + $0x288] sm:$0xff]  ;;  %v129_v56 = vld [vmem:[%s1801_s1 + $0x298] sm:$0xff]  ;;  %v987_v58 = vpack.c.bf16 %v122_v50, %v118_v49 }
  0x1c   :  { %1038 = vmatprep.subr.bf16.mxu1 %v1037_v16  ;;  %v124_v53 = vld [vmem:[%s1801_s1 + $0x270] sm:$0xff]  ;;  %v131_v55 = vld [vmem:[%s1801_s1 + $0x2a8] sm:$0xff]  ;;  %v133_v57 = vld [vmem:[%s1801_s1 + $0x2b8] sm:$0xff] }
  0x1d   :  { %v1051_v59 = vpack.c.bf16 %v124_v53, %v120_v51  ;;  %v989_v60 = vpack.c.bf16 %v131_v55, %v127_v54  ;;  %v126_v61 = vld [vmem:[%s1801_s1 + $0x280] sm:$0xff]  ;;  %v128_v63 = vld [vmem:[%s1801_s1 + $0x290] sm:$0xff]  ;;  %v1053_v0 = vpack.c.bf16 %v133_v57, %v129_v56  ;;  %v135_v2 = vld [vmem:[%s1801_s1 + $0x2c8] sm:$0xff] }
  0x1e   :  { %976 = vmatpush1.bf16.msra.mxu0 %v975_v22  ;;  %v130_v62 = vld [vmem:[%s1801_s1 + $0x2a0] sm:$0xff]  ;;  %v132_v1 = vld [vmem:[%s1801_s1 + $0x2b0] sm:$0xff]  ;;  %v139_v3 = vld [vmem:[%s1801_s1 + $0x2e8] sm:$0xff] }
  0x1f   :  { %1040 = vmatpush1.bf16.msra.mxu1 %v1039_v23  ;;  %978 = vmatprep.subr.bf16.mxu0 %v977_v24  ;;  %v137_v4 = vld [vmem:[%s1801_s1 + $0x2d8] sm:$0xff]  ;;  %v991_v6 = vpack.c.bf16 %v130_v62, %v126_v61  ;;  %v134_v7 = vld [vmem:[%s1801_s1 + $0x2c0] sm:$0xff]  ;;  %v1055_v8 = vpack.c.bf16 %v132_v1, %v128_v63  ;;  %v993_v9 = vpack.c.bf16 %v139_v3, %v135_v2  ;;  %v136_v11 = vld [vmem:[%s1801_s1 + $0x2d0] sm:$0xff] }
  0x20   :  { %1042 = vmatprep.subr.bf16.mxu1 %v1041_v28  ;;  %v141_v5 = vld [vmem:[%s1801_s1 + $0x2f8] sm:$0xff]  ;;  %v138_v10 = vld [vmem:[%s1801_s1 + $0x2e0] sm:$0xff]  ;;  %v140_v12 = vld [vmem:[%s1801_s1 + $0x2f0] sm:$0xff] }
  0x21   :  { %v1057_v13 = vpack.c.bf16 %v141_v5, %v137_v4  ;;  %v143_v14 = vld [vmem:[%s1801_s1 + $0x308] sm:$0xff]  ;;  %v145_v17 = vld [vmem:[%s1801_s1 + $0x318] sm:$0xff]  ;;  %v995_v19 = vpack.c.bf16 %v138_v10, %v134_v7  ;;  %v1059_v20 = vpack.c.bf16 %v140_v12, %v136_v11  ;;  %v142_v22 = vld [vmem:[%s1801_s1 + $0x300] sm:$0xff] }
  0x22   :  { %980 = vmatpush1.bf16.msra.mxu0 %v979_v34  ;;  %v147_v15 = vld [vmem:[%s1801_s1 + $0x328] sm:$0xff]  ;;  %v149_v18 = vld [vmem:[%s1801_s1 + $0x338] sm:$0xff]  ;;  %v146_v23 = vld [vmem:[%s1801_s1 + $0x320] sm:$0xff] }
  0x23   :  { %1044 = vmatpush1.bf16.msra.mxu1 %v1043_v35  ;;  %982 = vmatprep.subr.bf16.mxu0 %v981_v36  ;;  %v15_v16 = vld [vmem:[%s1802_s0 + $0x8] sm:$0xff]  ;;  %v997_v21 = vpack.c.bf16 %v147_v15, %v143_v14  ;;  %v144_v24 = vld [vmem:[%s1801_s1 + $0x310] sm:$0xff]  ;;  %v1061_v25 = vpack.c.bf16 %v149_v18, %v145_v17  ;;  %v153_v29 = vld [vmem:[%s1801_s1 + $0x358] sm:$0xff]  ;;  %v999_v31 = vpack.c.bf16 %v146_v23, %v142_v22 }
  0x24   :  { %1046 = vmatprep.subr.bf16.mxu1 %v1045_v40  ;;  %238 = vmatprep.mubr.f32.mxu0 %v15_v16  ;;  %v148_v26 = vld [vmem:[%s1801_s1 + $0x330] sm:$0xff]  ;;  %v151_v27 = vld [vmem:[%s1801_s1 + $0x348] sm:$0xff]  ;;  %v157_v30 = vld [vmem:[%s1801_s1 + $0x378] sm:$0xff] }
  0x25   :  { %399 = vmatprep.mubr.f32.mxu1 %v15_v16  ;;  %v155_v28 = vld [vmem:[%s1801_s1 + $0x368] sm:$0xff]  ;;  %v1063_v32 = vpack.c.bf16 %v148_v26, %v144_v24  ;;  %v150_v34 = vld [vmem:[%s1801_s1 + $0x340] sm:$0xff]  ;;  %v152_v36 = vld [vmem:[%s1801_s1 + $0x350] sm:$0xff]  ;;  %v1065_v37 = vpack.c.bf16 %v157_v30, %v153_v29 }
  0x26   :  { %984 = vmatpush1.bf16.msra.mxu0 %v983_v46  ;;  %v1001_v33 = vpack.c.bf16 %v155_v28, %v151_v27  ;;  %v154_v35 = vld [vmem:[%s1801_s1 + $0x360] sm:$0xff]  ;;  %v156_v38 = vld [vmem:[%s1801_s1 + $0x370] sm:$0xff]  ;;  %v159_v39 = vld [vmem:[%s1801_s1 + $0x388] sm:$0xff] }
  0x27   :  { %1048 = vmatpush1.bf16.msra.mxu1 %v1047_v47  ;;  %986 = vmatprep.subr.bf16.mxu0 %v985_v48  ;;  %v163_v40 = vld [vmem:[%s1801_s1 + $0x3a8] sm:$0xff]  ;;  %v161_v41 = vld [vmem:[%s1801_s1 + $0x398] sm:$0xff]  ;;  %v1003_v43 = vpack.c.bf16 %v154_v35, %v150_v34  ;;  %v1067_v44 = vpack.c.bf16 %v156_v38, %v152_v36  ;;  %v158_v46 = vld [vmem:[%s1801_s1 + $0x380] sm:$0xff] }
  0x28   :  { %1050 = vmatprep.subr.bf16.mxu1 %v1049_v52  ;;  %v165_v42 = vld [vmem:[%s1801_s1 + $0x3b8] sm:$0xff]  ;;  %v1005_v45 = vpack.c.bf16 %v163_v40, %v159_v39  ;;  %v162_v47 = vld [vmem:[%s1801_s1 + $0x3a0] sm:$0xff]  ;;  %v160_v48 = vld [vmem:[%s1801_s1 + $0x390] sm:$0xff] }
  0x29   :  { %v1069_v49 = vpack.c.bf16 %v165_v42, %v161_v41  ;;  %v164_v50 = vld [vmem:[%s1801_s1 + $0x3b0] sm:$0xff]  ;;  %v167_v51 = vld [vmem:[%s1801_s1 + $0x3c8] sm:$0xff]  ;;  %v169_v53 = vld [vmem:[%s1801_s1 + $0x3d8] sm:$0xff]  ;;  %v1007_v55 = vpack.c.bf16 %v162_v47, %v158_v46 }
  0x2a   :  { %988 = vmatpush1.bf16.msra.mxu0 %v987_v58  ;;  %v171_v52 = vld [vmem:[%s1801_s1 + $0x3e8] sm:$0xff]  ;;  %v173_v54 = vld [vmem:[%s1801_s1 + $0x3f8] sm:$0xff]  ;;  %v1071_v56 = vpack.c.bf16 %v164_v50, %v160_v48  ;;  %v166_v58 = vld [vmem:[%s1801_s1 + $0x3c0] sm:$0xff] }
  0x2b   :  { %1052 = vmatpush1.bf16.msra.mxu1 %v1051_v59  ;;  %990 = vmatprep.subr.bf16.mxu0 %v989_v60  ;;  %v1009_v57 = vpack.c.bf16 %v171_v52, %v167_v51  ;;  %v170_v59 = vld [vmem:[%s1801_s1 + $0x3e0] sm:$0xff]  ;;  %v168_v60 = vld [vmem:[%s1801_s1 + $0x3d0] sm:$0xff]  ;;  %v1073_v61 = vpack.c.bf16 %v173_v54, %v169_v53  ;;  %v593_v5 = vld [vmem:[%s1803_s2 + $0x8] sm:$0xff] }
  0x2c   :  { %1054 = vmatprep.subr.bf16.mxu1 %v1053_v0  ;;  %v172_v62 = vld [vmem:[%s1801_s1 + $0x3f0] sm:$0xff]  ;;  %v608_v63 = vld [vmem:[%s1803_s2 + $0x80] sm:$0xff]  ;;  %v609_v0 = vld [vmem:[%s1803_s2 + $0x88] sm:$0xff]  ;;  %v1011_v1 = vpack.c.bf16 %v170_v59, %v166_v58 }
  0x2d   :  { %v1075_v2 = vpack.c.bf16 %v172_v62, %v168_v60  ;;  %v1077_v3 = vpack.c.bf16 %v609_v0, %v608_v63  ;;  %v592_v4 = vld [vmem:[%s1803_s2] sm:$0xff]  ;;  %v611_v7 = vld [vmem:[%s1803_s2 + $0x98] sm:$0xff]  ;;  %v594_v12 = vld [vmem:[%s1803_s2 + $0x10] sm:$0xff] }
  0x2e   :  { %992 = vmatpush1.bf16.msra.mxu0 %v991_v6  ;;  %v610_v6 = vld [vmem:[%s1803_s2 + $0x90] sm:$0xff]  ;;  %v1079_v10 = vpack.c.bf16 %v593_v5, %v592_v4  ;;  %v612_v14 = vld [vmem:[%s1803_s2 + $0xa0] sm:$0xff]  ;;  %v613_v15 = vld [vmem:[%s1803_s2 + $0xa8] sm:$0xff] }
  0x2f   :  { %1056 = vmatpush1.bf16.msra.mxu1 %v1055_v8  ;;  %994 = vmatprep.subr.bf16.mxu0 %v993_v9  ;;  %v14_v8 = vld [vmem:[%s1802_s0] sm:$0xff]  ;;  %v17_v9 = vld [vmem:[%s1802_s0 + $0x18] sm:$0xff]  ;;  %v1081_v11 = vpack.c.bf16 %v611_v7, %v610_v6  ;;  %v16_v16 = vld [vmem:[%s1802_s0 + $0x10] sm:$0xff] }
  0x30   :  { %1058 = vmatprep.subr.bf16.mxu1 %v1057_v13  ;;  %v595_v13 = vld [vmem:[%s1803_s2 + $0x18] sm:$0xff]  ;;  %v19_v17 = vld [vmem:[%s1802_s0 + $0x28] sm:$0xff]  ;;  %v614_v22 = vld [vmem:[%s1803_s2 + $0xb0] sm:$0xff] }
  0x31   :  { %v1083_v18 = vpack.c.bf16 %v595_v13, %v594_v12  ;;  %v615_v23 = vld [vmem:[%s1803_s2 + $0xb8] sm:$0xff]  ;;  %v18_v24 = vld [vmem:[%s1802_s0 + $0x20] sm:$0xff]  ;;  %v598_v28 = vld [vmem:[%s1803_s2 + $0x30] sm:$0xff] }
  0x32   :  { %996 = vmatpush1.bf16.msra.mxu0 %v995_v19  ;;  %v1085_v19 = vpack.c.bf16 %v613_v15, %v612_v14  ;;  %v1089_v27 = vpack.c.bf16 %v615_v23, %v614_v22  ;;  %v599_v29 = vld [vmem:[%s1803_s2 + $0x38] sm:$0xff]  ;;  %v616_v30 = vld [vmem:[%s1803_s2 + $0xc0] sm:$0xff]  ;;  %v618_v38 = vld [vmem:[%s1803_s2 + $0xd0] sm:$0xff] }
  0x33   :  { %1060 = vmatpush1.bf16.msra.mxu1 %v1059_v20  ;;  %998 = vmatprep.subr.bf16.mxu0 %v997_v21  ;;  %v596_v20 = vld [vmem:[%s1803_s2 + $0x20] sm:$0xff]  ;;  %v597_v21 = vld [vmem:[%s1803_s2 + $0x28] sm:$0xff]  ;;  %v1091_v34 = vpack.c.bf16 %v599_v29, %v598_v28  ;;  %v619_v39 = vld [vmem:[%s1803_s2 + $0xd8] sm:$0xff] }
  0x34   :  { %1062 = vmatprep.subr.bf16.mxu1 %v1061_v25  ;;  %v21_v25 = vld [vmem:[%s1802_s0 + $0x38] sm:$0xff]  ;;  %v1087_v26 = vpack.c.bf16 %v597_v21, %v596_v20  ;;  %v600_v36 = vld [vmem:[%s1803_s2 + $0x40] sm:$0xff]  ;;  %v621_v47 = vld [vmem:[%s1803_s2 + $0xe8] sm:$0xff] }
  0x35   :  { %v22_v40 = vld [vmem:[%s1802_s0 + $0x40] sm:$0xff]  ;;  %v25_v41 = vld [vmem:[%s1802_s0 + $0x58] sm:$0xff]  ;;  %v24_v48 = vld [vmem:[%s1802_s0 + $0x50] sm:$0xff] }
  0x36   :  { %1000 = vmatpush1.bf16.msra.mxu0 %v999_v31  ;;  %v617_v31 = vld [vmem:[%s1803_s2 + $0xc8] sm:$0xff]  ;;  %v620_v46 = vld [vmem:[%s1803_s2 + $0xe0] sm:$0xff]  ;;  %v29_v53 = vld [vmem:[%s1802_s0 + $0x78] sm:$0xff] }
  0x37   :  { %1064 = vmatpush1.bf16.msra.mxu1 %v1063_v32  ;;  %1002 = vmatprep.subr.bf16.mxu0 %v1001_v33  ;;  %v20_v32 = vld [vmem:[%s1802_s0 + $0x30] sm:$0xff]  ;;  %v23_v33 = vld [vmem:[%s1802_s0 + $0x48] sm:$0xff]  ;;  %v1093_v35 = vpack.c.bf16 %v617_v31, %v616_v30  ;;  %v1101_v51 = vpack.c.bf16 %v621_v47, %v620_v46  ;;  %v26_v52 = vld [vmem:[%s1802_s0 + $0x60] sm:$0xff] }
  0x38   :  { %1066 = vmatprep.subr.bf16.mxu1 %v1065_v37  ;;  %v601_v37 = vld [vmem:[%s1803_s2 + $0x48] sm:$0xff]  ;;  %v28_v54 = vld [vmem:[%s1802_s0 + $0x70] sm:$0xff]  ;;  %v34_v60 = vld [vmem:[%s1802_s0 + $0xa0] sm:$0xff] }
  0x39   :  { %v1095_v42 = vpack.c.bf16 %v601_v37, %v600_v36  ;;  %v32_v58 = vld [vmem:[%s1802_s0 + $0x90] sm:$0xff]  ;;  %v35_v59 = vld [vmem:[%s1802_s0 + $0xa8] sm:$0xff]  ;;  %v38_v0 = vld [vmem:[%s1802_s0 + $0xc0] sm:$0xff] }
  0x3a   :  { %1004 = vmatpush1.bf16.msra.mxu0 %v1003_v43  ;;  %v1097_v43 = vpack.c.bf16 %v619_v39, %v618_v38  ;;  %v36_v62 = vld [vmem:[%s1802_s0 + $0xb0] sm:$0xff]  ;;  %v39_v63 = vld [vmem:[%s1802_s0 + $0xc8] sm:$0xff]  ;;  %v42_v4 = vld [vmem:[%s1802_s0 + $0xe0] sm:$0xff] }
  0x3b   :  { %1068 = vmatpush1.bf16.msra.mxu1 %v1067_v44  ;;  %1006 = vmatprep.subr.bf16.mxu0 %v1005_v45  ;;  %v602_v44 = vld [vmem:[%s1803_s2 + $0x50] sm:$0xff]  ;;  %v603_v45 = vld [vmem:[%s1803_s2 + $0x58] sm:$0xff]  ;;  %v604_v7 = vld [vmem:[%s1803_s2 + $0x60] sm:$0xff] }
  0x3c   :  { %1070 = vmatprep.subr.bf16.mxu1 %v1069_v49  ;;  %v27_v49 = vld [vmem:[%s1802_s0 + $0x68] sm:$0xff]  ;;  %v1099_v50 = vpack.c.bf16 %v603_v45, %v602_v44  ;;  %v45_v5 = vld [vmem:[%s1802_s0 + $0xf8] sm:$0xff]  ;;  %v44_v6 = vld [vmem:[%s1802_s0 + $0xf0] sm:$0xff] }
  0x3d   :  { %v606_v13 = vld [vmem:[%s1803_s2 + $0x70] sm:$0xff]  ;;  %v607_v14 = vld [vmem:[%s1803_s2 + $0x78] sm:$0xff] }
  0x3e   :  { %1008 = vmatpush1.bf16.msra.mxu0 %v1007_v55  ;;  %v31_v55 = vld [vmem:[%s1802_s0 + $0x88] sm:$0xff]  ;;  %v1107_v15 = vpack.c.bf16 %v607_v14, %v606_v13 }
  0x3f   :  { %1072 = vmatpush1.bf16.msra.mxu1 %v1071_v56  ;;  %1010 = vmatprep.subr.bf16.mxu0 %v1009_v57  ;;  %v30_v56 = vld [vmem:[%s1802_s0 + $0x80] sm:$0xff]  ;;  %v33_v57 = vld [vmem:[%s1802_s0 + $0x98] sm:$0xff] }
  0x40   :  { %1074 = vmatprep.subr.bf16.mxu1 %v1073_v61  ;;  %v37_v61 = vld [vmem:[%s1802_s0 + $0xb8] sm:$0xff] }
  0x42   :  { %1012 = vmatpush1.bf16.msra.mxu0 %v1011_v1  ;;  %v41_v1 = vld [vmem:[%s1802_s0 + $0xd8] sm:$0xff] }
  0x43   :  { %1076 = vmatpush1.bf16.msra.mxu1 %v1075_v2  ;;  %1078 = vmatprep.subr.bf16.mxu0 %v1077_v3  ;;  %v40_v2 = vld [vmem:[%s1802_s0 + $0xd0] sm:$0xff] }
  0x44   :  { %1109 = vmatprep.subr.bf16.mxu1 %v1077_v3  ;;  %v43_v3 = vld [vmem:[%s1802_s0 + $0xe8] sm:$0xff] }
  0x45   :  { %239 = vmatmul.mubr.f32.vlgmr.msra.gmra.mrb[0].mxu0 %v14_v8 }
  0x46   :  { %400 = vmatmul.mubr.f32.vlgmr.msra.gmra.mrb[0].mxu1 %v14_v8  ;;  %244 = vmatprep.mubr.f32.mxu0 %v17_v9  ;;  %v605_v8 = vld [vmem:[%s1803_s2 + $0x68] sm:$0xff] }
  0x47   :  { %405 = vmatprep.mubr.f32.mxu1 %v17_v9  ;;  %1080 = vmatpush3.bf16.msra.mxu0 %v1079_v10  ;;  %v1103_v9 = vpack.c.bf16 %v605_v8, %v604_v7 }
  0x48   :  { %1117 = vmatpush3.bf16.msra.mxu1 %v1079_v10  ;;  %1082 = vmatprep.subr.bf16.mxu0 %v1081_v11  ;;  %v622_v10 = vld [vmem:[%s1803_s2 + $0xf0] sm:$0xff] }
  0x49   :  { %245 = vmatmul.mubr.f32.gmra.mrb[2].mxu0 %v16_v16  ;;  %1110 = vmatprep.subr.bf16.mxu1 %v1081_v11  ;;  %v623_v11 = vld [vmem:[%s1803_s2 + $0xf8] sm:$0xff] }
  0x4a   :  { %406 = vmatmul.mubr.f32.gmra.mrb[2].mxu1 %v16_v16  ;;  %250 = vmatprep.mubr.f32.mxu0 %v19_v17  ;;  %v1105_v12 = vpack.c.bf16 %v623_v11, %v622_v10 }
  0x4b   :  { %411 = vmatprep.mubr.f32.mxu1 %v19_v17  ;;  %1084 = vmatpush3.bf16.msra.mxu0 %v1083_v18 }
  0x4c   :  { %1118 = vmatpush3.bf16.msra.mxu1 %v1083_v18  ;;  %1086 = vmatprep.subr.bf16.mxu0 %v1085_v19 }
  0x4d   :  { %251 = vmatmul.mubr.f32.gmra.mrb[4].mxu0 %v18_v24  ;;  %1111 = vmatprep.subr.bf16.mxu1 %v1085_v19 }
  0x4e   :  { %412 = vmatmul.mubr.f32.gmra.mrb[4].mxu1 %v18_v24  ;;  %256 = vmatprep.mubr.f32.mxu0 %v21_v25 }
  0x4f   :  { %417 = vmatprep.mubr.f32.mxu1 %v21_v25  ;;  %1088 = vmatpush3.bf16.msra.mxu0 %v1087_v26 }
  0x50   :  { %1090 = vmatprep.subr.bf16.mxu0 %v1089_v27  ;;  %1119 = vmatpush3.bf16.msra.mxu1 %v1087_v26 }
  0x51   :  { %257 = vmatmul.mubr.f32.gmra.mrb[6].mxu0 %v20_v32  ;;  %1112 = vmatprep.subr.bf16.mxu1 %v1089_v27 }
  0x52   :  { %418 = vmatmul.mubr.f32.gmra.mrb[6].mxu1 %v20_v32  ;;  %262 = vmatprep.mubr.f32.mxu0 %v23_v33 }
  0x53   :  { %423 = vmatprep.mubr.f32.mxu1 %v23_v33  ;;  %1092 = vmatpush3.bf16.msra.mxu0 %v1091_v34 }
  0x54   :  { %1094 = vmatprep.subr.bf16.mxu0 %v1093_v35  ;;  %1120 = vmatpush3.bf16.msra.mxu1 %v1091_v34 }
  0x55   :  { %263 = vmatmul.mubr.f32.gmra.mrb[8].mxu0 %v22_v40  ;;  %1113 = vmatprep.subr.bf16.mxu1 %v1093_v35 }
  0x56   :  { %424 = vmatmul.mubr.f32.gmra.mrb[8].mxu1 %v22_v40  ;;  %268 = vmatprep.mubr.f32.mxu0 %v25_v41 }
  0x57   :  { %429 = vmatprep.mubr.f32.mxu1 %v25_v41  ;;  %1096 = vmatpush3.bf16.msra.mxu0 %v1095_v42 }
  0x58   :  { %1098 = vmatprep.subr.bf16.mxu0 %v1097_v43  ;;  %1121 = vmatpush3.bf16.msra.mxu1 %v1095_v42 }
  0x59   :  { %269 = vmatmul.mubr.f32.gmra.mrb[10].mxu0 %v24_v48  ;;  %1114 = vmatprep.subr.bf16.mxu1 %v1097_v43 }
  0x5a   :  { %430 = vmatmul.mubr.f32.gmra.mrb[10].mxu1 %v24_v48  ;;  %274 = vmatprep.mubr.f32.mxu0 %v27_v49 }
  0x5b   :  { %435 = vmatprep.mubr.f32.mxu1 %v27_v49  ;;  %1100 = vmatpush3.bf16.msra.mxu0 %v1099_v50 }
  0x5c   :  { %1102 = vmatprep.subr.bf16.mxu0 %v1101_v51  ;;  %1122 = vmatpush3.bf16.msra.mxu1 %v1099_v50 }
  0x5d   :  { %275 = vmatmul.mubr.f32.gmra.mrb[12].mxu0 %v26_v52  ;;  %1115 = vmatprep.subr.bf16.mxu1 %v1101_v51 }
  0x5e   :  { %436 = vmatmul.mubr.f32.gmra.mrb[12].mxu1 %v26_v52  ;;  %280 = vmatprep.mubr.f32.mxu0 %v29_v53 }
  0x5f   :  { %441 = vmatprep.mubr.f32.mxu1 %v29_v53  ;;  %1104 = vmatpush3.bf16.msra.mxu0 %v1103_v9 }
  0x60   :  { %1123 = vmatpush3.bf16.msra.mxu1 %v1103_v9  ;;  %1106 = vmatprep.subr.bf16.mxu0 %v1105_v12 }
  0x61   :  { %281 = vmatmul.mubr.f32.gmra.mrb[14].mxu0 %v28_v54  ;;  %1116 = vmatprep.subr.bf16.mxu1 %v1105_v12 }
  0x62   :  { %442 = vmatmul.mubr.f32.gmra.mrb[14].mxu1 %v28_v54  ;;  %286 = vmatprep.mubr.f32.mxu0 %v31_v55 }
  0x63   :  { %447 = vmatprep.mubr.f32.mxu1 %v31_v55  ;;  %1108 = vmatpush3.bf16.msra.mxu0 %v1107_v15 }
  0x64   :  { %1124 = vmatpush3.bf16.msra.mxu1 %v1107_v15 }
  0x65   :  { %287 = vmatmul.mubr.f32.gmra.mrb[16].mxu0 %v30_v56 }
  0x66   :  { %448 = vmatmul.mubr.f32.gmra.mrb[16].mxu1 %v30_v56  ;;  %292 = vmatprep.mubr.f32.mxu0 %v33_v57 }
  0x67   :  { %453 = vmatprep.mubr.f32.mxu1 %v33_v57 }
  0x69   :  { %293 = vmatmul.mubr.f32.gmra.mrb[18].mxu0 %v32_v58 }
  0x6a   :  { %454 = vmatmul.mubr.f32.gmra.mrb[18].mxu1 %v32_v58  ;;  %298 = vmatprep.mubr.f32.mxu0 %v35_v59 }
  0x6b   :  { %459 = vmatprep.mubr.f32.mxu1 %v35_v59 }
  0x6d   :  { %299 = vmatmul.mubr.f32.gmra.mrb[20].mxu0 %v34_v60 }
  0x6e   :  { %460 = vmatmul.mubr.f32.gmra.mrb[20].mxu1 %v34_v60  ;;  %304 = vmatprep.mubr.f32.mxu0 %v37_v61 }
  0x6f   :  { %465 = vmatprep.mubr.f32.mxu1 %v37_v61 }
  0x71   :  { %305 = vmatmul.mubr.f32.gmra.mrb[22].mxu0 %v36_v62 }
  0x72   :  { %466 = vmatmul.mubr.f32.gmra.mrb[22].mxu1 %v36_v62  ;;  %310 = vmatprep.mubr.f32.mxu0 %v39_v63 }
  0x73   :  { %471 = vmatprep.mubr.f32.mxu1 %v39_v63 }
  0x75   :  { %311 = vmatmul.mubr.f32.gmra.mrb[24].mxu0 %v38_v0 }
  0x76   :  { %472 = vmatmul.mubr.f32.gmra.mrb[24].mxu1 %v38_v0  ;;  %316 = vmatprep.mubr.f32.mxu0 %v41_v1 }
  0x77   :  { %477 = vmatprep.mubr.f32.mxu1 %v41_v1 }
  0x79   :  { %317 = vmatmul.mubr.f32.gmra.mrb[26].mxu0 %v40_v2 }
  0x7a   :  { %478 = vmatmul.mubr.f32.gmra.mrb[26].mxu1 %v40_v2  ;;  %322 = vmatprep.mubr.f32.mxu0 %v43_v3 }
  0x7b   :  { %483 = vmatprep.mubr.f32.mxu1 %v43_v3 }
  0x7d   :  { %323 = vmatmul.mubr.f32.gmra.mrb[28].mxu0 %v42_v4 }
  0x7e   :  { %484 = vmatmul.mubr.f32.gmra.mrb[28].mxu1 %v42_v4  ;;  %328 = vmatprep.mubr.f32.mxu0 %v45_v5 }
  0x7f   :  { %489 = vmatprep.mubr.f32.mxu1 %v45_v5 }
  0x81   :  { %329 = vmatmul.mubr.f32.gmra.mrb[30].mxu0 %v44_v6 }
  0x82   :  { %490 = vmatmul.mubr.f32.gmra.mrb[30].mxu1 %v44_v6 }
 0x118   :  { %v240_v16 = vpop.f32.mrb[0].mxu0 }
 0x119   :  { %v496_v17 = vmul.f32 %v240_v16, %v240_v16  ;;  %v401_v18 = vpop.f32.mrb[0].mxu1  ;;  %v242_v19 = vpop.f32.mrb[1].mxu0 }
 0x11a   :  { %v528_v20 = vmul.f32 %v401_v18, %v401_v18  ;;  %v497_v21 = vmul.f32 %v242_v19, %v242_v19  ;;  %v403_v22 = vpop.f32.mrb[1].mxu1 }
 0x11b   :  { %v529_v23 = vmul.f32 %v403_v22, %v403_v22 }
 0x11c   :  { %v560_v24 = vadd.f32 %v528_v20, %v496_v17  ;;  %v246_v25 = vpop.f32.mrb[2].mxu0 }
 0x11d   :  { %v561_v26 = vadd.f32 %v529_v23, %v497_v21  ;;  %v498_v27 = vmul.f32 %v246_v25, %v246_v25  ;;  %v407_v28 = vpop.f32.mrb[2].mxu1  ;;  %v248_v29 = vpop.f32.mrb[3].mxu0 }
 0x11e   :  { %v530_v30 = vmul.f32 %v407_v28, %v407_v28  ;;  %v499_v31 = vmul.f32 %v248_v29, %v248_v29  ;;  %v409_v32 = vpop.f32.mrb[3].mxu1 }
 0x11f   :  { %v531_v33 = vmul.f32 %v409_v32, %v409_v32  ;;  %688 = vmatprep.mubr.f32.mxu0 %v561_v26 }
 0x120   :  { %v562_v34 = vadd.f32 %v530_v30, %v498_v27  ;;  %689 = vmatmul.mubr.f32.vlgmr.msra.gmra.mrb[32].mxu0 %v560_v24  ;;  %v252_v35 = vpop.f32.mrb[4].mxu0 }
 0x121   :  { %v563_v36 = vadd.f32 %v531_v33, %v499_v31  ;;  %v500_v37 = vmul.f32 %v252_v35, %v252_v35  ;;  %v413_v38 = vpop.f32.mrb[4].mxu1  ;;  %v254_v39 = vpop.f32.mrb[5].mxu0 }
 0x122   :  { %v532_v40 = vmul.f32 %v413_v38, %v413_v38  ;;  %v501_v41 = vmul.f32 %v254_v39, %v254_v39  ;;  %v415_v42 = vpop.f32.mrb[5].mxu1 }
 0x123   :  { %v533_v43 = vmul.f32 %v415_v42, %v415_v42  ;;  %693 = vmatprep.mubr.f32.mxu0 %v563_v36 }
 0x124   :  { %v564_v44 = vadd.f32 %v532_v40, %v500_v37  ;;  %694 = vmatmul.mubr.f32.gmra.mrb[34].mxu0 %v562_v34  ;;  %v258_v45 = vpop.f32.mrb[6].mxu0 }
 0x125   :  { %v565_v46 = vadd.f32 %v533_v43, %v501_v41  ;;  %v502_v47 = vmul.f32 %v258_v45, %v258_v45  ;;  %v419_v48 = vpop.f32.mrb[6].mxu1  ;;  %v260_v49 = vpop.f32.mrb[7].mxu0 }
 0x126   :  { %v534_v50 = vmul.f32 %v419_v48, %v419_v48  ;;  %v503_v51 = vmul.f32 %v260_v49, %v260_v49  ;;  %v421_v52 = vpop.f32.mrb[7].mxu1 }
 0x127   :  { %v535_v53 = vmul.f32 %v421_v52, %v421_v52  ;;  %698 = vmatprep.mubr.f32.mxu0 %v565_v46 }
 0x128   :  { %v566_v54 = vadd.f32 %v534_v50, %v502_v47  ;;  %699 = vmatmul.mubr.f32.gmra.mrb[36].mxu0 %v564_v44  ;;  %v264_v55 = vpop.f32.mrb[8].mxu0 }
 0x129   :  { %v567_v56 = vadd.f32 %v535_v53, %v503_v51  ;;  %v504_v57 = vmul.f32 %v264_v55, %v264_v55  ;;  %v425_v58 = vpop.f32.mrb[8].mxu1  ;;  %v266_v59 = vpop.f32.mrb[9].mxu0 }
 0x12a   :  { %v536_v60 = vmul.f32 %v425_v58, %v425_v58  ;;  %v505_v61 = vmul.f32 %v266_v59, %v266_v59  ;;  %v427_v62 = vpop.f32.mrb[9].mxu1 }
 0x12b   :  { %v537_v63 = vmul.f32 %v427_v62, %v427_v62  ;;  %703 = vmatprep.mubr.f32.mxu0 %v567_v56 }
 0x12c   :  { %v568_v0 = vadd.f32 %v536_v60, %v504_v57  ;;  %704 = vmatmul.mubr.f32.gmra.mrb[38].mxu0 %v566_v54  ;;  %v270_v1 = vpop.f32.mrb[10].mxu0 }
 0x12d   :  { %v569_v2 = vadd.f32 %v537_v63, %v505_v61  ;;  %v506_v3 = vmul.f32 %v270_v1, %v270_v1  ;;  %v431_v4 = vpop.f32.mrb[10].mxu1  ;;  %v272_v5 = vpop.f32.mrb[11].mxu0 }
 0x12e   :  { %v538_v6 = vmul.f32 %v431_v4, %v431_v4  ;;  %v507_v7 = vmul.f32 %v272_v5, %v272_v5  ;;  %v433_v8 = vpop.f32.mrb[11].mxu1 }
 0x12f   :  { %v539_v9 = vmul.f32 %v433_v8, %v433_v8  ;;  %708 = vmatprep.mubr.f32.mxu0 %v569_v2 }
 0x130   :  { %v570_v10 = vadd.f32 %v538_v6, %v506_v3  ;;  %709 = vmatmul.mubr.f32.gmra.mrb[40].mxu0 %v568_v0  ;;  %v276_v11 = vpop.f32.mrb[12].mxu0 }
 0x131   :  { %v571_v12 = vadd.f32 %v539_v9, %v507_v7  ;;  %v508_v13 = vmul.f32 %v276_v11, %v276_v11  ;;  %v437_v14 = vpop.f32.mrb[12].mxu1  ;;  %v278_v15 = vpop.f32.mrb[13].mxu0 }
 0x132   :  { %v540_v16 = vmul.f32 %v437_v14, %v437_v14  ;;  %v509_v17 = vmul.f32 %v278_v15, %v278_v15  ;;  %v439_v18 = vpop.f32.mrb[13].mxu1 }
 0x133   :  { %v541_v19 = vmul.f32 %v439_v18, %v439_v18  ;;  %713 = vmatprep.mubr.f32.mxu0 %v571_v12 }
 0x134   :  { %v572_v20 = vadd.f32 %v540_v16, %v508_v13  ;;  %714 = vmatmul.mubr.f32.gmra.mrb[42].mxu0 %v570_v10  ;;  %v282_v21 = vpop.f32.mrb[14].mxu0 }
 0x135   :  { %v573_v22 = vadd.f32 %v541_v19, %v509_v17  ;;  %v510_v23 = vmul.f32 %v282_v21, %v282_v21  ;;  %v443_v24 = vpop.f32.mrb[14].mxu1  ;;  %v284_v25 = vpop.f32.mrb[15].mxu0 }
 0x136   :  { %v542_v26 = vmul.f32 %v443_v24, %v443_v24  ;;  %v511_v27 = vmul.f32 %v284_v25, %v284_v25  ;;  %v445_v28 = vpop.f32.mrb[15].mxu1 }
 0x137   :  { %v543_v29 = vmul.f32 %v445_v28, %v445_v28  ;;  %718 = vmatprep.mubr.f32.mxu0 %v573_v22 }
 0x138   :  { %v574_v30 = vadd.f32 %v542_v26, %v510_v23  ;;  %719 = vmatmul.mubr.f32.gmra.mrb[44].mxu0 %v572_v20  ;;  %v288_v31 = vpop.f32.mrb[16].mxu0 }
 0x139   :  { %v575_v32 = vadd.f32 %v543_v29, %v511_v27  ;;  %v512_v33 = vmul.f32 %v288_v31, %v288_v31  ;;  %v449_v34 = vpop.f32.mrb[16].mxu1  ;;  %v290_v35 = vpop.f32.mrb[17].mxu0 }
 0x13a   :  { %v544_v36 = vmul.f32 %v449_v34, %v449_v34  ;;  %v513_v37 = vmul.f32 %v290_v35, %v290_v35  ;;  %v451_v38 = vpop.f32.mrb[17].mxu1 }
 0x13b   :  { %v545_v39 = vmul.f32 %v451_v38, %v451_v38  ;;  %723 = vmatprep.mubr.f32.mxu0 %v575_v32 }
 0x13c   :  { %v576_v40 = vadd.f32 %v544_v36, %v512_v33  ;;  %724 = vmatmul.mubr.f32.gmra.mrb[46].mxu0 %v574_v30  ;;  %v294_v41 = vpop.f32.mrb[18].mxu0 }
 0x13d   :  { %v577_v42 = vadd.f32 %v545_v39, %v513_v37  ;;  %v514_v43 = vmul.f32 %v294_v41, %v294_v41  ;;  %v455_v44 = vpop.f32.mrb[18].mxu1  ;;  %v296_v45 = vpop.f32.mrb[19].mxu0 }
 0x13e   :  { %v546_v46 = vmul.f32 %v455_v44, %v455_v44  ;;  %v515_v47 = vmul.f32 %v296_v45, %v296_v45  ;;  %v457_v48 = vpop.f32.mrb[19].mxu1 }
 0x13f   :  { %v547_v49 = vmul.f32 %v457_v48, %v457_v48  ;;  %728 = vmatprep.mubr.f32.mxu1 %v577_v42 }
 0x140   :  { %v578_v50 = vadd.f32 %v546_v46, %v514_v43  ;;  %729 = vmatmul.mubr.f32.vlgmr.msra.gmra.mrb[32].mxu1 %v576_v40  ;;  %v300_v51 = vpop.f32.mrb[20].mxu0 }
 0x141   :  { %v579_v52 = vadd.f32 %v547_v49, %v515_v47  ;;  %v516_v53 = vmul.f32 %v300_v51, %v300_v51  ;;  %v461_v54 = vpop.f32.mrb[20].mxu1  ;;  %v302_v55 = vpop.f32.mrb[21].mxu0 }
 0x142   :  { %v548_v56 = vmul.f32 %v461_v54, %v461_v54  ;;  %v517_v57 = vmul.f32 %v302_v55, %v302_v55  ;;  %v463_v58 = vpop.f32.mrb[21].mxu1 }
 0x143   :  { %v549_v59 = vmul.f32 %v463_v58, %v463_v58  ;;  %733 = vmatprep.mubr.f32.mxu1 %v579_v52 }
 0x144   :  { %v580_v60 = vadd.f32 %v548_v56, %v516_v53  ;;  %734 = vmatmul.mubr.f32.gmra.mrb[34].mxu1 %v578_v50  ;;  %v306_v61 = vpop.f32.mrb[22].mxu0 }
 0x145   :  { %v581_v62 = vadd.f32 %v549_v59, %v517_v57  ;;  %v518_v63 = vmul.f32 %v306_v61, %v306_v61  ;;  %v467_v0 = vpop.f32.mrb[22].mxu1  ;;  %v308_v1 = vpop.f32.mrb[23].mxu0 }
 0x146   :  { %v550_v2 = vmul.f32 %v467_v0, %v467_v0  ;;  %v519_v3 = vmul.f32 %v308_v1, %v308_v1  ;;  %v469_v4 = vpop.f32.mrb[23].mxu1 }
 0x147   :  { %v551_v5 = vmul.f32 %v469_v4, %v469_v4  ;;  %738 = vmatprep.mubr.f32.mxu1 %v581_v62 }
 0x148   :  { %v582_v6 = vadd.f32 %v550_v2, %v518_v63  ;;  %739 = vmatmul.mubr.f32.gmra.mrb[36].mxu1 %v580_v60  ;;  %v312_v7 = vpop.f32.mrb[24].mxu0 }
 0x149   :  { %v583_v8 = vadd.f32 %v551_v5, %v519_v3  ;;  %v520_v9 = vmul.f32 %v312_v7, %v312_v7  ;;  %v473_v10 = vpop.f32.mrb[24].mxu1  ;;  %v314_v11 = vpop.f32.mrb[25].mxu0 }
 0x14a   :  { %v552_v12 = vmul.f32 %v473_v10, %v473_v10  ;;  %v521_v13 = vmul.f32 %v314_v11, %v314_v11  ;;  %v475_v14 = vpop.f32.mrb[25].mxu1 }
 0x14b   :  { %v553_v15 = vmul.f32 %v475_v14, %v475_v14  ;;  %743 = vmatprep.mubr.f32.mxu1 %v583_v8 }
 0x14c   :  { %v584_v16 = vadd.f32 %v552_v12, %v520_v9  ;;  %744 = vmatmul.mubr.f32.gmra.mrb[38].mxu1 %v582_v6  ;;  %v318_v17 = vpop.f32.mrb[26].mxu0 }
 0x14d   :  { %v585_v18 = vadd.f32 %v553_v15, %v521_v13  ;;  %v522_v19 = vmul.f32 %v318_v17, %v318_v17  ;;  %v479_v20 = vpop.f32.mrb[26].mxu1  ;;  %v320_v21 = vpop.f32.mrb[27].mxu0 }
 0x14e   :  { %v554_v22 = vmul.f32 %v479_v20, %v479_v20  ;;  %v523_v23 = vmul.f32 %v320_v21, %v320_v21  ;;  %v481_v24 = vpop.f32.mrb[27].mxu1 }
 0x14f   :  { %v555_v25 = vmul.f32 %v481_v24, %v481_v24  ;;  %748 = vmatprep.mubr.f32.mxu1 %v585_v18 }
 0x150   :  { %v586_v26 = vadd.f32 %v554_v22, %v522_v19  ;;  %749 = vmatmul.mubr.f32.gmra.mrb[40].mxu1 %v584_v16  ;;  %v324_v27 = vpop.f32.mrb[28].mxu0 }
 0x151   :  { %v587_v28 = vadd.f32 %v555_v25, %v523_v23  ;;  %v524_v29 = vmul.f32 %v324_v27, %v324_v27  ;;  %v485_v30 = vpop.f32.mrb[28].mxu1  ;;  %v326_v31 = vpop.f32.mrb[29].mxu0 }
 0x152   :  { %v556_v32 = vmul.f32 %v485_v30, %v485_v30  ;;  %v525_v33 = vmul.f32 %v326_v31, %v326_v31  ;;  %v487_v34 = vpop.f32.mrb[29].mxu1 }
 0x153   :  { %v557_v35 = vmul.f32 %v487_v34, %v487_v34  ;;  %753 = vmatprep.mubr.f32.mxu1 %v587_v28 }
 0x154   :  { %v588_v36 = vadd.f32 %v556_v32, %v524_v29  ;;  %754 = vmatmul.mubr.f32.gmra.mrb[42].mxu1 %v586_v26  ;;  %v330_v37 = vpop.f32.mrb[30].mxu0 }
 0x155   :  { %v589_v38 = vadd.f32 %v557_v35, %v525_v33  ;;  %v526_v39 = vmul.f32 %v330_v37, %v330_v37  ;;  %v491_v40 = vpop.f32.mrb[30].mxu1  ;;  %v332_v41 = vpop.f32.mrb[31].mxu0 }
 0x156   :  { %v558_v42 = vmul.f32 %v491_v40, %v491_v40  ;;  %v527_v43 = vmul.f32 %v332_v41, %v332_v41  ;;  %v493_v44 = vpop.f32.mrb[31].mxu1 }
 0x157   :  { %v559_v45 = vmul.f32 %v493_v44, %v493_v44  ;;  %758 = vmatprep.mubr.f32.mxu1 %v589_v38 }
 0x158   :  { %v590_v46 = vadd.f32 %v558_v42, %v526_v39  ;;  %759 = vmatmul.mubr.f32.gmra.mrb[44].mxu1 %v588_v36 }
 0x159   :  { %v591_v47 = vadd.f32 %v559_v45, %v527_v43 }
 0x15b   :  { %763 = vmatprep.mubr.f32.mxu1 %v591_v47 }
 0x15c   :  { %764 = vmatmul.mubr.f32.gmra.mrb[46].mxu1 %v590_v46 }
 0x1f3   :  { %v901_v48 = vpop.f32.mrb[32].mxu0 }
 0x1f4   :  { %v902_v49 = vpop.f32.mrb[33].mxu0 }
 0x1f5   :  { %v903_v50 = vadd.f32 %v902_v49, %v901_v48 }
 0x1f7   :  { %v769_v51 = vmax.f32 %v903_v50, 1e-06  ;;  %v904_v52 = vpop.f32.mrb[34].mxu0 }
 0x1f8   :  { %v905_v53 = vpop.f32.mrb[35].mxu0 }
 0x1f9   :  { %1125 = vlog2.f32 %v769_v51  ;;  %v906_v54 = vadd.f32 %v905_v53, %v904_v52 }
 0x1fb   :  { %v770_v55 = vmax.f32 %v906_v54, 1e-06  ;;  %v907_v56 = vpop.f32.mrb[36].mxu0 }
 0x1fc   :  { %v908_v57 = vpop.f32.mrb[37].mxu0 }
 0x1fd   :  { %1127 = vlog2.f32 %v770_v55  ;;  %v909_v58 = vadd.f32 %v908_v57, %v907_v56 }
 0x1ff   :  { %v771_v59 = vmax.f32 %v909_v58, 1e-06  ;;  %v910_v60 = vpop.f32.mrb[38].mxu0 }
 0x200   :  { %v911_v61 = vpop.f32.mrb[39].mxu0 }
 0x201   :  { %1129 = vlog2.f32 %v771_v59  ;;  %v912_v62 = vadd.f32 %v911_v61, %v910_v60 }
 0x203   :  { %v1126_v63 = vpop.eup %1125  ;;  %v772_v0 = vmax.f32 %v912_v62, 1e-06  ;;  %v913_v1 = vpop.f32.mrb[40].mxu0 }
 0x204   :  { %v786_v2 = vmul.f32 0.6931472, %v1126_v63  ;;  %v914_v3 = vpop.f32.mrb[41].mxu0 }
 0x205   :  { %1131 = vlog2.f32 %v772_v0  ;;  %v915_v4 = vadd.f32 %v914_v3, %v913_v1 }
 0x206   :  { %v817_v5 = vmul.f32 0.4342945, %v786_v2 }
 0x207   :  { %v1128_v6 = vpop.eup %1127  ;;  %v773_v7 = vmax.f32 %v915_v4, 1e-06  ;;  %v916_v8 = vpop.f32.mrb[42].mxu0 }
 0x208   :  { %v833_v9 = vmul.f32 10.0, %v817_v5  ;;  %v788_v10 = vmul.f32 0.6931472, %v1128_v6  ;;  %v917_v11 = vpop.f32.mrb[43].mxu0 }
 0x209   :  { %1133 = vlog2.f32 %v773_v7  ;;  %v918_v12 = vadd.f32 %v917_v11, %v916_v8 }
 0x20a   :  { %849 = vst [vmem:[%s1804_s3] sm:$0xff] %v833_v9  ;;  %v818_v13 = vmul.f32 0.4342945, %v788_v10 }
 0x20b   :  { %v1130_v14 = vpop.eup %1129  ;;  %v774_v15 = vmax.f32 %v918_v12, 1e-06  ;;  %v919_v16 = vpop.f32.mrb[44].mxu0 }
 0x20c   :  { %v834_v17 = vmul.f32 10.0, %v818_v13  ;;  %v790_v18 = vmul.f32 0.6931472, %v1130_v14  ;;  %v920_v19 = vpop.f32.mrb[45].mxu0 }
 0x20d   :  { %1135 = vlog2.f32 %v774_v15  ;;  %v921_v20 = vadd.f32 %v920_v19, %v919_v16 }
 0x20e   :  { %850 = vst [vmem:[%s1804_s3 + $0x8] sm:$0xff] %v834_v17  ;;  %v819_v21 = vmul.f32 0.4342945, %v790_v18 }
 0x20f   :  { %v1132_v22 = vpop.eup %1131  ;;  %v775_v23 = vmax.f32 %v921_v20, 1e-06  ;;  %v922_v24 = vpop.f32.mrb[46].mxu0 }
 0x210   :  { %v835_v25 = vmul.f32 10.0, %v819_v21  ;;  %v792_v26 = vmul.f32 0.6931472, %v1132_v22  ;;  %v923_v27 = vpop.f32.mrb[47].mxu0 }
 0x211   :  { %1137 = vlog2.f32 %v775_v23  ;;  %v924_v28 = vadd.f32 %v923_v27, %v922_v24 }
 0x212   :  { %851 = vst [vmem:[%s1804_s3 + $0x10] sm:$0xff] %v835_v25  ;;  %v820_v29 = vmul.f32 0.4342945, %v792_v26 }
 0x213   :  { %v1134_v30 = vpop.eup %1133  ;;  %v776_v31 = vmax.f32 %v924_v28, 1e-06  ;;  %v925_v32 = vpop.f32.mrb[32].mxu1 }
 0x214   :  { %v836_v33 = vmul.f32 10.0, %v820_v29  ;;  %v794_v34 = vmul.f32 0.6931472, %v1134_v30  ;;  %v926_v35 = vpop.f32.mrb[33].mxu1 }
 0x215   :  { %1139 = vlog2.f32 %v776_v31  ;;  %v927_v36 = vadd.f32 %v926_v35, %v925_v32 }
 0x216   :  { %852 = vst [vmem:[%s1804_s3 + $0x18] sm:$0xff] %v836_v33  ;;  %v821_v37 = vmul.f32 0.4342945, %v794_v34 }
 0x217   :  { %v1136_v38 = vpop.eup %1135  ;;  %v777_v39 = vmax.f32 %v927_v36, 1e-06  ;;  %v928_v40 = vpop.f32.mrb[34].mxu1 }
 0x218   :  { %v837_v41 = vmul.f32 10.0, %v821_v37  ;;  %v796_v42 = vmul.f32 0.6931472, %v1136_v38  ;;  %v929_v43 = vpop.f32.mrb[35].mxu1 }
 0x219   :  { %1141 = vlog2.f32 %v777_v39  ;;  %v930_v44 = vadd.f32 %v929_v43, %v928_v40 }
 0x21a   :  { %853 = vst [vmem:[%s1804_s3 + $0x20] sm:$0xff] %v837_v41  ;;  %v822_v45 = vmul.f32 0.4342945, %v796_v42 }
 0x21b   :  { %v1138_v46 = vpop.eup %1137  ;;  %v778_v47 = vmax.f32 %v930_v44, 1e-06  ;;  %v931_v48 = vpop.f32.mrb[36].mxu1 }
 0x21c   :  { %v838_v49 = vmul.f32 10.0, %v822_v45  ;;  %v798_v50 = vmul.f32 0.6931472, %v1138_v46  ;;  %v932_v51 = vpop.f32.mrb[37].mxu1 }
 0x21d   :  { %1143 = vlog2.f32 %v778_v47  ;;  %v933_v52 = vadd.f32 %v932_v51, %v931_v48 }
 0x21e   :  { %854 = vst [vmem:[%s1804_s3 + $0x28] sm:$0xff] %v838_v49  ;;  %v823_v53 = vmul.f32 0.4342945, %v798_v50 }
 0x21f   :  { %v1140_v54 = vpop.eup %1139  ;;  %v779_v55 = vmax.f32 %v933_v52, 1e-06  ;;  %v934_v56 = vpop.f32.mrb[38].mxu1 }
 0x220   :  { %v839_v57 = vmul.f32 10.0, %v823_v53  ;;  %v800_v58 = vmul.f32 0.6931472, %v1140_v54  ;;  %v935_v59 = vpop.f32.mrb[39].mxu1 }
 0x221   :  { %1145 = vlog2.f32 %v779_v55  ;;  %v936_v60 = vadd.f32 %v935_v59, %v934_v56 }
 0x222   :  { %855 = vst [vmem:[%s1804_s3 + $0x30] sm:$0xff] %v839_v57  ;;  %v824_v61 = vmul.f32 0.4342945, %v800_v58 }
 0x223   :  { %v1142_v62 = vpop.eup %1141  ;;  %v780_v63 = vmax.f32 %v936_v60, 1e-06  ;;  %v937_v0 = vpop.f32.mrb[40].mxu1 }
 0x224   :  { %v840_v1 = vmul.f32 10.0, %v824_v61  ;;  %v802_v2 = vmul.f32 0.6931472, %v1142_v62  ;;  %v938_v3 = vpop.f32.mrb[41].mxu1 }
 0x225   :  { %1147 = vlog2.f32 %v780_v63  ;;  %v939_v4 = vadd.f32 %v938_v3, %v937_v0 }
 0x226   :  { %856 = vst [vmem:[%s1804_s3 + $0x38] sm:$0xff] %v840_v1  ;;  %v825_v5 = vmul.f32 0.4342945, %v802_v2 }
 0x227   :  { %v1144_v6 = vpop.eup %1143  ;;  %v781_v7 = vmax.f32 %v939_v4, 1e-06  ;;  %v940_v8 = vpop.f32.mrb[42].mxu1 }
 0x228   :  { %v841_v9 = vmul.f32 10.0, %v825_v5  ;;  %v804_v10 = vmul.f32 0.6931472, %v1144_v6  ;;  %v941_v11 = vpop.f32.mrb[43].mxu1 }
 0x229   :  { %1149 = vlog2.f32 %v781_v7  ;;  %v942_v12 = vadd.f32 %v941_v11, %v940_v8 }
 0x22a   :  { %857 = vst [vmem:[%s1804_s3 + $0x40] sm:$0xff] %v841_v9  ;;  %v826_v13 = vmul.f32 0.4342945, %v804_v10 }
 0x22b   :  { %v1146_v14 = vpop.eup %1145  ;;  %v782_v15 = vmax.f32 %v942_v12, 1e-06  ;;  %v943_v16 = vpop.f32.mrb[44].mxu1 }
 0x22c   :  { %v842_v17 = vmul.f32 10.0, %v826_v13  ;;  %v806_v18 = vmul.f32 0.6931472, %v1146_v14  ;;  %v944_v19 = vpop.f32.mrb[45].mxu1 }
 0x22d   :  { %1151 = vlog2.f32 %v782_v15  ;;  %v945_v20 = vadd.f32 %v944_v19, %v943_v16 }
 0x22e   :  { %858 = vst [vmem:[%s1804_s3 + $0x48] sm:$0xff] %v842_v17  ;;  %v827_v21 = vmul.f32 0.4342945, %v806_v18 }
 0x22f   :  { %v1148_v22 = vpop.eup %1147  ;;  %v783_v23 = vmax.f32 %v945_v20, 1e-06  ;;  %v946_v24 = vpop.f32.mrb[46].mxu1 }
 0x230   :  { %v843_v25 = vmul.f32 10.0, %v827_v21  ;;  %v808_v26 = vmul.f32 0.6931472, %v1148_v22  ;;  %v947_v27 = vpop.f32.mrb[47].mxu1 }
 0x231   :  { %1153 = vlog2.f32 %v783_v23  ;;  %v948_v28 = vadd.f32 %v947_v27, %v946_v24 }
 0x232   :  { %859 = vst [vmem:[%s1804_s3 + $0x50] sm:$0xff] %v843_v25  ;;  %v828_v29 = vmul.f32 0.4342945, %v808_v26 }
 0x233   :  { %v1150_v30 = vpop.eup %1149  ;;  %v784_v31 = vmax.f32 %v948_v28, 1e-06 }
 0x234   :  { %v844_v32 = vmul.f32 10.0, %v828_v29  ;;  %v810_v33 = vmul.f32 0.6931472, %v1150_v30 }
 0x235   :  { %1155 = vlog2.f32 %v784_v31 }
 0x236   :  { %860 = vst [vmem:[%s1804_s3 + $0x58] sm:$0xff] %v844_v32  ;;  %v829_v34 = vmul.f32 0.4342945, %v810_v33 }
 0x237   :  { %v1152_v35 = vpop.eup %1151 }
 0x238   :  { %v845_v36 = vmul.f32 10.0, %v829_v34  ;;  %v812_v37 = vmul.f32 0.6931472, %v1152_v35 }
 0x23a   :  { %861 = vst [vmem:[%s1804_s3 + $0x60] sm:$0xff] %v845_v36  ;;  %v830_v38 = vmul.f32 0.4342945, %v812_v37 }
 0x23b   :  { %v1154_v39 = vpop.eup %1153 }
 0x23c   :  { %v846_v40 = vmul.f32 10.0, %v830_v38  ;;  %v814_v41 = vmul.f32 0.6931472, %v1154_v39 }
 0x23e   :  { %862 = vst [vmem:[%s1804_s3 + $0x68] sm:$0xff] %v846_v40  ;;  %v831_v42 = vmul.f32 0.4342945, %v814_v41 }
 0x23f   :  { %v1156_v43 = vpop.eup %1155 }
 0x240   :  { %v847_v44 = vmul.f32 10.0, %v831_v42  ;;  %v816_v45 = vmul.f32 0.6931472, %v1156_v43 }
 0x242   :  { %863 = vst [vmem:[%s1804_s3 + $0x70] sm:$0xff] %v847_v44  ;;  %v832_v46 = vmul.f32 0.4342945, %v816_v45 }
 0x244   :  { %v848_v47 = vmul.f32 10.0, %v832_v46 }
 0x246   :  { %864 = vst [vmem:[%s1804_s3 + $0x78] sm:$0xff] %v848_v47 }

</bundles_post_ra>
